<compile_context>
chip_gen: v7x
topology: tpu7x:2x2x1
jax: 0.10.0
libtpu: 0.0.40
codegen_flags: <defaults>
</compile_context>

<pallas_src>
import functools
import math

import jax
import jax.numpy as jnp
from jax import lax
from jax.experimental import pallas as pl
from jax.experimental.pallas import tpu as pltpu


# --------------------------------------------------------------------------
# Stage 1: normalize, fold sqrt(1/T), positive / self logits.  O(N*D).
# --------------------------------------------------------------------------
def _prep_kernel(zi_ref, zj_ref, reps_ref, pos_ref, sd_ref, *, scale):
    zi = zi_ref[...].astype(jnp.float32)
    zj = zj_ref[...].astype(jnp.float32)
    # F.normalize(dim=1, eps=1e-12): x / max(||x||, eps)
    #   == x * rsqrt(max(||x||^2, eps^2))   (rsqrt -> EUP, multiply -> VPU)
    zi_n = zi * lax.rsqrt(jnp.maximum(jnp.sum(zi * zi, axis=-1, keepdims=True), 1e-24))
    zj_n = zj * lax.rsqrt(jnp.maximum(jnp.sum(zj * zj, axis=-1, keepdims=True), 1e-24))
    zi_s = zi_n * jnp.float32(scale)   # scale = sqrt(1/T): (a*s)·(b*s) = (a·b)/T
    zj_s = zj_n * jnp.float32(scale)
    reps_ref[0] = zi_s
    reps_ref[1] = zj_s
    # Positive logit cos(z_i, z_j)/T (appears twice in the CE sum) and the
    # self-similarity cos(z, z)/T used to remove the masked diagonal outside.
    pos_ref[...] = jnp.sum(zi_s * zj_s, axis=-1, keepdims=True)
    sd_ref[0] = jnp.sum(zi_s * zi_s, axis=-1, keepdims=True)
    sd_ref[1] = jnp.sum(zj_s * zj_s, axis=-1, keepdims=True)


# --------------------------------------------------------------------------
# Stage 2: flash-style shifted sum-exp over the (2N, 2N) similarity matrix.
# --------------------------------------------------------------------------
def _sumexp_kernel(q_ref, kt_ref, out_ref, acc_ref, *, inv_t, bk, acc_w,
                   k_resident):
    kc = pl.program_id(1)

    @pl.when(kc == 0)
    def _():
        acc_ref[...] = jnp.zeros_like(acc_ref)

    if k_resident and bk != kt_ref.shape[-1]:
        # K is VMEM-resident (copied from HBM once); take a 128-aligned lane
        # chunk of it for this step.
        start = pl.multiple_of(kc * bk, bk)
        kt = kt_ref[:, pl.ds(start, bk)]
    else:
        kt = kt_ref[...]

    # (bq, d_pad) @ (d_pad, bk): native NN matmul on the MXU (K was
    # pre-transposed once outside, so no per-tile XLU transpose here).
    s = jnp.dot(q_ref[...], kt, preferred_element_type=jnp.float32)
    # Unit-norm rows => s <= 1/T: shift by the constant bound instead of a
    # running row max.  Keep everything in f32 (bf16 would ruin exp(-2/T)).
    p = jnp.exp(s - jnp.float32(inv_t))
    # Per-lane-group accumulation: 128-aligned static lane slices of p are
    # free vreg selections and the adds run on the VPU, keeping the XLU out
    # of the O(N^2) inner loop entirely.  The single cross-lane 128->1 reduce
    # happens in the O(N) JAX combine.
    part = p[:, 0:acc_w]
    for j in range(1, bk // acc_w):
        part = part + p[:, j * acc_w:(j + 1) * acc_w]
    acc_ref[...] += part

    @pl.when(kc == pl.num_programs(1) - 1)
    def _():
        out_ref[...] = acc_ref[...]


# --------------------------------------------------------------------------
# Wrapper.
# --------------------------------------------------------------------------
def _round_up(x, mult):
    return (x + mult - 1) // mult * mult


def _pick_block(total, candidates, *, prefer_split=False):
    """Largest candidate tiling `total`; optionally require >= 2 tiles."""
    if prefer_split:
        for c in candidates:
            if c <= total and total % c == 0 and total // c >= 2:
                return c
    for c in candidates:
        if c <= total and total % c == 0:
            return c
    return total  # full extent is always a legal block


def _vmem_limit(estimate_bytes):
    # Generous but within v7x's 64 MiB/TensorCore physical VMEM.
    return int(min(64 * 1024 * 1024, max(32 * 1024 * 1024, 2 * estimate_bytes)))


def ntxent_loss(z_i, z_j, temperature=0.5, *, block_n=None, block_q=None,
                block_k=None, k_resident=None):
    """NT-Xent (SimCLR) loss; z_i, z_j: (N, D).  Returns scalar float32 loss.

    Numerical notes (from the review): the constant-shift logsumexp and the
    outside-the-kernel diagonal removal assume exp(-2/T) does not underflow
    in f32 (temperature >= ~0.03, always true in practice); all exp work and
    accumulators are kept in f32.
    """
    assert z_i.shape == z_j.shape and z_i.ndim == 2
    n, d = z_i.shape
    m = 2 * n
    inv_t = 1.0 / float(temperature)
    scale = math.sqrt(inv_t)

    # Zero-pad the feature dim to a multiple of 128 (MXU contraction / lane
    # dim); zeros change no norm or dot product.
    d_pad = max(128, _round_up(d, 128))
    if d_pad != d:
        z_i = jnp.pad(z_i, ((0, 0), (0, d_pad - d)))
        z_j = jnp.pad(z_j, ((0, 0), (0, d_pad - d)))

    bn = block_n or _pick_block(n, (256, 128, 64, 32, 16, 8))
    assert n % bn == 0 and (bn == n or bn % 8 == 0)

    # ---- Stage 1 ---------------------------------------------------------
    est1 = (4 * bn * d_pad + 4 * bn * d_pad + 16 * bn) * 4  # dbl-buffered io
    reps, pos, sd = pl.pallas_call(
        functools.partial(_prep_kernel, scale=scale),
        grid=(n // bn,),
        in_specs=[pl.BlockSpec((bn, d_pad), lambda i: (i, 0)),
                  pl.BlockSpec((bn, d_pad), lambda i: (i, 0))],
        out_specs=(pl.BlockSpec((2, bn, d_pad), lambda i: (0, i, 0)),
                   pl.BlockSpec((bn, 1), lambda i: (i, 0)),
                   pl.BlockSpec((2, bn, 1), lambda i: (0, i, 0))),
        out_shape=(jax.ShapeDtypeStruct((2, n, d_pad), jnp.float32),
                   jax.ShapeDtypeStruct((n, 1), jnp.float32),
                   jax.ShapeDtypeStruct((2, n, 1), jnp.float32)),
        compiler_params=pltpu.CompilerParams(
            dimension_semantics=("parallel",),
            vmem_limit_bytes=_vmem_limit(est1)),
    )(z_i, z_j)

    reps = reps.reshape(m, d_pad)  # (2, N, Dp) -> (2N, Dp): contiguous, free
    # One-time O(2N*Dp) transpose so stage 2 is a native NN matmul; this keeps
    # per-tile XLU transposes out of the O(N^2) inner loop.
    reps_t = reps.T                # (Dp, 2N)

    # ---- Stage-2 block / residency selection ------------------------------
    if k_resident is None:
        # Pin the whole K operand in VMEM when it (double-buffered) stays well
        # inside v7x's per-TensorCore budget; this removes the (m/bq)x HBM
        # re-read of reps (the dominant leak identified in the review).
        k_resident = d_pad * m * 4 <= 12 * 1024 * 1024

    bq = block_q or _pick_block(m, (512, 256, 128, 64, 32, 16, 8),
                                prefer_split=True)  # >= 2 row blocks for v7x
    if block_k is not None:
        bk = block_k
    elif k_resident:
        bk = m if m <= 512 else _pick_block(m, (512, 256, 128))
    else:
        bk = _pick_block(m, (512, 256, 128))
    assert m % bq == 0 and m % bk == 0
    assert bq == m or bq % 8 == 0
    # Transposed-K layout: BlockSpec lane dim / in-kernel lane slices must be
    # 128-aligned or full width.
    assert bk == m or bk % 128 == 0, \
        "block_k must be a multiple of 128 (or the full 2N width)"
    acc_w = 128 if bk % 128 == 0 else bk   # per-lane-group accumulator width

    if k_resident:
        kt_spec = pl.BlockSpec((d_pad, m), lambda qr, kc: (0, 0))  # copied once
        k_block_bytes = d_pad * m * 4
        k_hbm_bytes = m * d_pad * 4
    else:
        kt_spec = pl.BlockSpec((d_pad, bk), lambda qr, kc: (0, kc))
        k_block_bytes = d_pad * bk * 4
        k_hbm_bytes = (m // bq) * m * d_pad * 4

    est2 = (2 * (k_block_bytes + bq * d_pad * 4 + bq * acc_w * 4)
            + bq * acc_w * 4 + 4 * bq * bk * 4)
    cost = pl.CostEstimate(flops=2 * m * m * d_pad,
                           transcendentals=m * m,
                           bytes_accessed=m * d_pad * 4 + k_hbm_bytes
                           + m * acc_w * 4)

    part = pl.pallas_call(
        functools.partial(_sumexp_kernel, inv_t=inv_t, bk=bk, acc_w=acc_w,
                          k_resident=k_resident),
        grid=(m // bq, m // bk),
        in_specs=[pl.BlockSpec((bq, d_pad), lambda qr, kc: (qr, 0)), kt_spec],
        out_specs=pl.BlockSpec((bq, acc_w), lambda qr, kc: (qr, 0)),
        out_shape=jax.ShapeDtypeStruct((m, acc_w), jnp.float32),
        scratch_shapes=[pltpu.VMEM((bq, acc_w), jnp.float32)],
        compiler_params=pltpu.CompilerParams(
            dimension_semantics=("parallel", "arbitrary"),
            vmem_limit_bytes=_vmem_limit(est2)),
        cost_estimate=cost,
    )(reps, reps_t)

    # ---- O(N) combine (plain JAX) -----------------------------------------
    s_row = jnp.sum(part, axis=-1)           # shifted row sums incl. diagonal
    selfdot = sd.reshape(m)                  # cos(z,z)/T  (exact diagonal logit)
    denom = s_row - jnp.exp(selfdot - jnp.float32(inv_t))  # == masked_fill(-inf)
    lse = jnp.log(denom) + jnp.float32(inv_t)
    # Each positive logit appears twice in the CE numerator (rows i and n+i).
    return (jnp.sum(lse) - 2.0 * jnp.sum(pos)) / jnp.float32(m)


# --------------------------------------------------------------------------
# Pure-JAX reference mirroring the PyTorch module, for sanity checking.
# --------------------------------------------------------------------------
def _reference(z_i, z_j, temperature=0.5):
    n = z_i.shape[0]
    zi = z_i / jnp.maximum(jnp.linalg.norm(z_i, axis=1, keepdims=True), 1e-12)
    zj = z_j / jnp.maximum(jnp.linalg.norm(z_j, axis=1, keepdims=True), 1e-12)
    reps = jnp.concatenate([zi, zj], axis=0)
    sim = reps @ reps.T
    m = sim.shape[0]
    sim = jnp.where(jnp.eye(m, dtype=bool), -jnp.inf, sim) / temperature
    labels = jnp.concatenate([jnp.arange(n) + n, jnp.arange(n)])
    lse = jax.nn.logsumexp(sim, axis=-1)
    tgt = sim[jnp.arange(m), labels]
    return jnp.mean(lse - tgt)


if __name__ == "__main__":
    key = jax.random.PRNGKey(0)
    k1, k2, k3, k4, k5, k6 = jax.random.split(key, 6)

    # 1) Small shape straight from the module (batch=8, proj dim=32):
    #    resident-K path, feature dim padded 32 -> 128, tiny grids.
    N, D = 8, 32
    z_i = jax.random.normal(k1, (N, D), dtype=jnp.float32)
    z_j = jax.random.normal(k2, (N, D), dtype=jnp.float32)
    loss = jax.block_until_ready(ntxent_loss(z_i, z_j, temperature=0.5))
    ref = jax.block_until_ready(_reference(z_i, z_j, temperature=0.5))
    assert jnp.allclose(loss, ref, rtol=1e-5, atol=5e-5), (loss, ref)

    # 2) Resident-K path with a multi-chunk K loop (stage-2 grid (2, 2)):
    #    the kernel slices 128-aligned lane chunks from the pinned K operand.
    N2, D2 = 128, 64
    z_i2 = jax.random.normal(k3, (N2, D2), dtype=jnp.float32)
    z_j2 = jax.random.normal(k4, (N2, D2), dtype=jnp.float32)
    loss2 = jax.block_until_ready(
        ntxent_loss(z_i2, z_j2, temperature=0.5, block_q=128, block_k=128,
                    k_resident=True))
    ref2 = jax.block_until_ready(_reference(z_i2, z_j2, temperature=0.5))
    assert jnp.allclose(loss2, ref2, rtol=1e-5, atol=5e-5), (loss2, ref2)

    # 3) Streaming fallback path (what a K-too-big-to-pin run uses):
    #    stage-1 grid (2,), stage-2 grid (4, 2).
    N3, D3 = 128, 256
    z_i3 = jax.random.normal(k5, (N3, D3), dtype=jnp.float32)
    z_j3 = jax.random.normal(k6, (N3, D3), dtype=jnp.float32)
    loss3 = jax.block_until_ready(
        ntxent_loss(z_i3, z_j3, temperature=0.5, block_n=64, block_q=64,
                    block_k=128, k_resident=False))
    ref3 = jax.block_until_ready(_reference(z_i3, z_j3, temperature=0.5))
    assert jnp.allclose(loss3, ref3, rtol=1e-5, atol=5e-5), (loss3, ref3)

    print("KERNEL_OK")
</pallas_src>

<mosaic_0001>
module attributes {stable_mosaic.version = 11 : i64} {
  func.func @_prep_kernel(%arg0: i32, %arg1: memref<8x128xf32, #tpu.memory_space<vmem>>, %arg2: memref<8x128xf32, #tpu.memory_space<vmem>>, %arg3: memref<2x8x128xf32, #tpu.memory_space<vmem>>, %arg4: memref<8x1xf32, #tpu.memory_space<vmem>>, %arg5: memref<2x8x1xf32, #tpu.memory_space<vmem>>) attributes {dimension_semantics = [#tpu.dimension_semantics<parallel>], iteration_bounds = array<i64: 1>, scalar_prefetch = 0 : i64, scratch_operands = 0 : i64, tpu.core_type = #tpu.core_type<tc>, window_params = [{transform_indices = @transform_0, window_bounds = array<i64: 8, 128>}, {transform_indices = @transform_1, window_bounds = array<i64: 8, 128>}, {transform_indices = @transform_2, window_bounds = array<i64: 2, 8, 128>}, {transform_indices = @transform_3, window_bounds = array<i64: 8, 1>}, {transform_indices = @transform_4, window_bounds = array<i64: 2, 8, 1>}]} {
    %c0 = arith.constant 0 : index
    %c0_0 = arith.constant 0 : index
    %0 = vector.load %arg1[%c0, %c0_0] : memref<8x128xf32, #tpu.memory_space<vmem>>, vector<8x128xf32>
    %c0_1 = arith.constant 0 : index
    %c0_2 = arith.constant 0 : index
    %1 = vector.load %arg2[%c0_1, %c0_2] : memref<8x128xf32, #tpu.memory_space<vmem>>, vector<8x128xf32>
    %2 = arith.mulf %0, %0 : vector<8x128xf32>
    %cst = arith.constant dense<0.000000e+00> : vector<8xf32>
    %3 = vector.multi_reduction <add>, %2, %cst [1] : vector<8x128xf32> to vector<8xf32>
    %4 = vector.shape_cast %3 : vector<8xf32> to vector<8x1xf32>
    %cst_3 = arith.constant 1.000000e-24 : f32
    %5 = vector.broadcast %cst_3 : f32 to vector<8x1xf32>
    %6 = arith.maximumf %4, %5 : vector<8x1xf32>
    %7 = math.rsqrt %6 : vector<8x1xf32>
    %8 = vector.broadcast %7 : vector<8x1xf32> to vector<8x128xf32>
    %9 = arith.mulf %0, %8 : vector<8x128xf32>
    %10 = arith.mulf %1, %1 : vector<8x128xf32>
    %cst_4 = arith.constant dense<0.000000e+00> : vector<8xf32>
    %11 = vector.multi_reduction <add>, %10, %cst_4 [1] : vector<8x128xf32> to vector<8xf32>
    %12 = vector.shape_cast %11 : vector<8xf32> to vector<8x1xf32>
    %cst_5 = arith.constant 1.000000e-24 : f32
    %13 = vector.broadcast %cst_5 : f32 to vector<8x1xf32>
    %14 = arith.maximumf %12, %13 : vector<8x1xf32>
    %15 = math.rsqrt %14 : vector<8x1xf32>
    %16 = vector.broadcast %15 : vector<8x1xf32> to vector<8x128xf32>
    %17 = arith.mulf %1, %16 : vector<8x128xf32>
    %cst_6 = arith.constant 1.41421354 : f32
    %18 = vector.broadcast %cst_6 : f32 to vector<8x128xf32>
    %19 = arith.mulf %9, %18 : vector<8x128xf32>
    %cst_7 = arith.constant 1.41421354 : f32
    %20 = vector.broadcast %cst_7 : f32 to vector<8x128xf32>
    %21 = arith.mulf %17, %20 : vector<8x128xf32>
    %c0_8 = arith.constant 0 : index
    %c0_9 = arith.constant 0 : index
    %c0_10 = arith.constant 0 : index
    %22 = vector.load %arg3[%c0_8, %c0_9, %c0_10] : memref<2x8x128xf32, #tpu.memory_space<vmem>>, vector<1x8x128xf32>
    %23 = vector.shape_cast %22 : vector<1x8x128xf32> to vector<8x128xf32>
    %24 = vector.shape_cast %19 : vector<8x128xf32> to vector<1x8x128xf32>
    tpu.vector_store %arg3[%c0_8, %c0_9, %c0_10], %24 {strides = array<i32>} : memref<2x8x128xf32, #tpu.memory_space<vmem>>, vector<1x8x128xf32>,
    %c1 = arith.constant 1 : index
    %c0_11 = arith.constant 0 : index
    %c0_12 = arith.constant 0 : index
    %25 = vector.load %arg3[%c1, %c0_11, %c0_12] : memref<2x8x128xf32, #tpu.memory_space<vmem>>, vector<1x8x128xf32>
    %26 = vector.shape_cast %25 : vector<1x8x128xf32> to vector<8x128xf32>
    %27 = vector.shape_cast %21 : vector<8x128xf32> to vector<1x8x128xf32>
    tpu.vector_store %arg3[%c1, %c0_11, %c0_12], %27 {strides = array<i32>} : memref<2x8x128xf32, #tpu.memory_space<vmem>>, vector<1x8x128xf32>,
    %28 = arith.mulf %19, %21 : vector<8x128xf32>
    %cst_13 = arith.constant dense<0.000000e+00> : vector<8xf32>
    %29 = vector.multi_reduction <add>, %28, %cst_13 [1] : vector<8x128xf32> to vector<8xf32>
    %30 = vector.shape_cast %29 : vector<8xf32> to vector<8x1xf32>
    %c0_14 = arith.constant 0 : index
    %c0_15 = arith.constant 0 : index
    %31 = vector.load %arg4[%c0_14, %c0_15] : memref<8x1xf32, #tpu.memory_space<vmem>>, vector<8x1xf32>
    tpu.vector_store %arg4[%c0_14, %c0_15], %30 {strides = array<i32>} : memref<8x1xf32, #tpu.memory_space<vmem>>, vector<8x1xf32>,
    %32 = arith.mulf %19, %19 : vector<8x128xf32>
    %cst_16 = arith.constant dense<0.000000e+00> : vector<8xf32>
    %33 = vector.multi_reduction <add>, %32, %cst_16 [1] : vector<8x128xf32> to vector<8xf32>
    %34 = vector.shape_cast %33 : vector<8xf32> to vector<8x1xf32>
    %c0_17 = arith.constant 0 : index
    %c0_18 = arith.constant 0 : index
    %c0_19 = arith.constant 0 : index
    %35 = vector.load %arg5[%c0_17, %c0_18, %c0_19] : memref<2x8x1xf32, #tpu.memory_space<vmem>>, vector<1x8x1xf32>
    %36 = vector.shape_cast %35 : vector<1x8x1xf32> to vector<8x1xf32>
    %37 = vector.shape_cast %34 : vector<8x1xf32> to vector<1x8x1xf32>
    tpu.vector_store %arg5[%c0_17, %c0_18, %c0_19], %37 {strides = array<i32>} : memref<2x8x1xf32, #tpu.memory_space<vmem>>, vector<1x8x1xf32>,
    %38 = arith.mulf %21, %21 : vector<8x128xf32>
    %cst_20 = arith.constant dense<0.000000e+00> : vector<8xf32>
    %39 = vector.multi_reduction <add>, %38, %cst_20 [1] : vector<8x128xf32> to vector<8xf32>
    %40 = vector.shape_cast %39 : vector<8xf32> to vector<8x1xf32>
    %c1_21 = arith.constant 1 : index
    %c0_22 = arith.constant 0 : index
    %c0_23 = arith.constant 0 : index
    %41 = vector.load %arg5[%c1_21, %c0_22, %c0_23] : memref<2x8x1xf32, #tpu.memory_space<vmem>>, vector<1x8x1xf32>
    %42 = vector.shape_cast %41 : vector<1x8x1xf32> to vector<8x1xf32>
    %43 = vector.shape_cast %40 : vector<8x1xf32> to vector<1x8x1xf32>
    tpu.vector_store %arg5[%c1_21, %c0_22, %c0_23], %43 {strides = array<i32>} : memref<2x8x1xf32, #tpu.memory_space<vmem>>, vector<1x8x1xf32>,
    return
  }
  func.func @transform_0(%arg0: i32) -> (i32, i32) {
    %c0_i32 = arith.constant 0 : i32
    %c0_i32_0 = arith.constant 0 : i32
    return %arg0, %c0_i32 : i32, i32
  }
  func.func @transform_1(%arg0: i32) -> (i32, i32) {
    %c0_i32 = arith.constant 0 : i32
    %c0_i32_0 = arith.constant 0 : i32
    return %arg0, %c0_i32 : i32, i32
  }
  func.func @transform_2(%arg0: i32) -> (i32, i32, i32) {
    %c0_i32 = arith.constant 0 : i32
    %c0_i32_0 = arith.constant 0 : i32
    %c0_i32_1 = arith.constant 0 : i32
    return %c0_i32, %arg0, %c0_i32_0 : i32, i32, i32
  }
  func.func @transform_3(%arg0: i32) -> (i32, i32) {
    %c0_i32 = arith.constant 0 : i32
    %c0_i32_0 = arith.constant 0 : i32
    return %arg0, %c0_i32 : i32, i32
  }
  func.func @transform_4(%arg0: i32) -> (i32, i32, i32) {
    %c0_i32 = arith.constant 0 : i32
    %c0_i32_0 = arith.constant 0 : i32
    %c0_i32_1 = arith.constant 0 : i32
    return %c0_i32, %arg0, %c0_i32_0 : i32, i32, i32
  }
}

</mosaic_0001>

<bundles_post_ra>
// kernel: tpu_custom_call.1
= control target key start
LH: loop header
LB: loop body
LE: loop exit
PB: predicated region body
PF: predicated region fallthrough
CT: control target
= control target key end

     0   :  { %10 = vsyncpa [#allocation3], 0  ;;  %s255_s0 = inlined_call_operand.hbm [shape: f32[8,128], index: 0, kind: input, shape index: {}]   ;;  %s256_s1 = inlined_call_operand.hbm [shape: f32[8,128], index: 1, kind: input, shape index: {}]   ;;  %s257_s2 = inlined_call_operand.hbm [shape: f32[2,8,128], index: 2, kind: output, shape index: {0}]   ;;  %s258_s3 = inlined_call_operand.vmem [shape: f32[8,1], index: 3, kind: output, shape index: {1}]   ;;  %s259_s4 = inlined_call_operand.vmem [shape: f32[2,8,1], index: 4, kind: output, shape index: {2}]  }
   0x1   :  { %11 = vsyncpa [#allocation6], 0 }
   0x2   :  { %12 = vsyncpa [#allocation4], 0  ;;  %s180_s15 = smov [#allocation2]   ;;  %s181_s17 = smov [#allocation5]  }
   0x3   :  { %s19_s16 = sshll.u32 %s180_s15, 4  ;;  %s29_s18 = sshll.u32 %s181_s17, 4  ;;  %s20_s16 = int_to_ptr.vmem [resolvable:$true] %s19_s16  ;;  %s30_s18 = int_to_ptr.vmem [resolvable:$true] %s29_s18 }
   0x4   :  { %s108_s21 = scalar_lea.hbm %s255_s0, 128 }
   0x5   :  { %p109_p0 = scmp.ne.s32.totalorder %s255_s0, %s108_s21  ;;  %p112_p1 = scmp.lt.u32.totalorder %s108_s21, %s255_s0 }
   0x7   :  { %p114_p2 = pnand %p112_p1, %p109_p0 }
   0x9   :  { %117 = shalt.err (!%p114_p2)
}
   0xa   :  { %s118_s26 = scalar_lea.vmem %s20_s16, 128  ;;  %p123_p4 = scmp.lt.s32.totalorder %s20_s16, %s20_s16 }
   0xb   :  { %p119_p3 = scmp.ne.s32.totalorder %s20_s16, %s118_s26  ;;  %p124_p5 = scmp.lt.s32.totalorder %s118_s26, %s118_s26 }
   0xd   :  { %p125_p6 = por %p124_p5, %p123_p4 }
   0xf   :  { %p126_p7 = pnand %p125_p6, %p119_p3 }
  0x11   :  { %129 = shalt.err (!%p126_p7)
}
  0x12   :  { %22 = dma.hbm_to_vmem [thread:$0]  %s255_s0, 128, %s20_s16, [#allocation3]  }
  0x13   :  { %s130_s5 = scalar_lea.hbm %s256_s1, 128 }
  0x14   :  { %p131_p8 = scmp.ne.s32.totalorder %s256_s1, %s130_s5  ;;  %p134_p9 = scmp.lt.u32.totalorder %s130_s5, %s256_s1 }
  0x16   :  { %p136_p10 = pnand %p134_p9, %p131_p8 }
  0x18   :  { %139 = shalt.err (!%p136_p10)
}
  0x19   :  { %s140_s10 = scalar_lea.vmem %s30_s18, 128  ;;  %p145_p12 = scmp.lt.s32.totalorder %s30_s18, %s30_s18 }
  0x1a   :  { %p141_p11 = scmp.ne.s32.totalorder %s30_s18, %s140_s10  ;;  %p146_p13 = scmp.lt.s32.totalorder %s140_s10, %s140_s10 }
  0x1c   :  { %p147_p0 = por %p146_p13, %p145_p12 }
  0x1e   :  { %p148_p1 = pnand %p147_p0, %p141_p11 }
  0x20   :  { %151 = shalt.err (!%p148_p1)
}
  0x21   :  { %32 = dma.hbm_to_vmem [thread:$0]  %s256_s1, 128, %s30_s18, [#allocation6]  }
  0x22   :  { %174 = dma.done.wait [#allocation3], 128  }
  0x23   :  { %175 = vsyncadd [#allocation3], 4294967168 }
  0x24   :  { %176 = dma.done.wait [#allocation6], 128  }
  0x25   :  { %177 = vsyncadd [#allocation6], 4294967168  ;;  %v39_v0 = vld [vmem:[#allocation2] sm:$0xff]  ;;  %v40_v1 = vld [vmem:[#allocation5] sm:$0xff]  ;;  %s182_s1 = smov [#allocation7]  }
  0x26   :  { %v41_v2 = vmul.f32 %v39_v0, %v39_v0  ;;  %v47_v3 = vmul.f32 %v40_v1, %v40_v1  ;;  %s77_s12 = sshll.u32 %s182_s1, 4  ;;  %s78_s12 = int_to_ptr.vmem [resolvable:$true] %s77_s12 }
  0x27   :  { %s152_s13 = scalar_lea.vmem %s78_s12, 256  ;;  %p157_p3 = scmp.lt.s32.totalorder %s78_s12, %s78_s12 }
  0x28   :  { %42 = vadd.xlane.f32.xlu0 %v41_v2  ;;  %p153_p2 = scmp.ne.s32.totalorder %s78_s12, %s152_s13  ;;  %p158_p4 = scmp.lt.s32.totalorder %s152_s13, %s152_s13 }
  0x2a   :  { %p159_p5 = por %p158_p4, %p157_p3 }
  0x2c   :  { %48 = vadd.xlane.f32.xlu0 %v47_v3  ;;  %p160_p6 = pnand %p159_p5, %p153_p2 }
  0xb5   :  { %v43_v4 = vpop.xlane.xlu0 %42 }
  0xb6   :  { %v44_v5 = vmax.f32 %v43_v4, 1e-24 }
  0xb8   :  { %104 = vrsqrt.f32 %v44_v5 }
  0xb9   :  { %v49_v6 = vpop.xlane.xlu0 %48 }
  0xba   :  { %v50_v7 = vmax.f32 %v49_v6, 1e-24 }
  0xbc   :  { %106 = vrsqrt.f32 %v50_v7 }
  0xc2   :  { %v105_v8 = vpop.eup %104 }
  0xc3   :  { %v46_v9 = vmul.f32 %v105_v8, %v39_v0 }
  0xc5   :  { %v53_v10 = vmul.f32 1.4142135, %v46_v9 }
  0xc6   :  { %v107_v11 = vpop.eup %106 }
  0xc7   :  { %v52_v12 = vmul.f32 %v107_v11, %v40_v1  ;;  %55 = vst [vmem:[#allocation7] sm:$0xff] %v53_v10  ;;  %v63_v16 = vmul.f32 %v53_v10, %v53_v10 }
  0xc9   :  { %v54_v13 = vmul.f32 1.4142135, %v52_v12 }
  0xcb   :  { %v67_v14 = vmul.f32 %v54_v13, %v54_v13  ;;  %57 = vst [vmem:[#allocation7 + $0x8] sm:$0xff] %v54_v13  ;;  %v58_v15 = vmul.f32 %v54_v13, %v53_v10 }
  0xcd   :  { %68 = vadd.xlane.f32.xlu0 %v67_v14  ;;  %59 = vadd.xlane.f32.xlu1 %v58_v15 }
  0xd1   :  { %64 = vadd.xlane.f32.xlu1 %v63_v16 }
  0xd2   :  { %163 = shalt.err (!%p160_p6)
}
  0xd3   :  { %s164_s16 = scalar_lea.hbm %s257_s2, 256 }
  0xd4   :  { %p165_p7 = scmp.ne.s32.totalorder %s257_s2, %s164_s16  ;;  %p168_p8 = scmp.lt.u32.totalorder %s164_s16, %s257_s2 }
  0xd6   :  { %p170_p9 = pnand %p168_p8, %p165_p7 }
  0xd8   :  { %173 = shalt.err (!%p170_p9)
}
  0xd9   :  { %s183_s21 = smov 128   ;;  %s184_s22 = smov 8   ;;  %vm61_vm0 = vcmask 7168  }
  0xda   :  { %83 = dma.vmem_to_hbm [thread:$0]  %s78_s12, 256, %s257_s2, [#allocation4], %s183_s21, %s183_s21, %s184_s22  }
 0x15a   :  { %v69_v17 = vpop.xlane.xlu0 %68  ;;  %v60_v18 = vpop.xlane.xlu1 %59 }
 0x15b   :  { %98 = vst.msk [vmem:[%s259_s4 + $0x8] sm:$0xff] %vm61_vm0, %v69_v17  ;;  %62 = vst.msk [vmem:[%s258_s3] sm:$0xff] %vm61_vm0, %v60_v18 }
 0x15e   :  { %v65_v19 = vpop.xlane.xlu1 %64 }
 0x15f   :  { %66 = vst.msk [vmem:[%s259_s4] sm:$0xff] %vm61_vm0, %v65_v19 }
 0x160   :  { %178 = dma.done.wait [#allocation4], 256  }
 0x161   :  { %179 = vsyncadd [#allocation4], 4294967040 }
 0x162   :  { %95 = vsyncpa [#allocation3], 1 }
 0x163   :  { %96 = vsyncpa [#allocation6], 1 }
 0x164   :  { %97 = vsyncpa [#allocation4], 1 }

</bundles_post_ra>
